<compile_context>
chip_gen: v7x
topology: tpu7x:2x2x1
jax: 0.10.0
libtpu: 0.0.40
codegen_flags: <defaults>
</compile_context>

<pallas_src>
import functools

import jax
import jax.numpy as jnp
from jax.experimental import pallas as pl
from jax.experimental.pallas import tpu as pltpu


# ----------------------------------------------------------------------------
# Kernels
# ----------------------------------------------------------------------------

def _gate_epilogue(prev, y, state_dim, out_ref):
    """Shared elementwise tail: gates + relu + blend, f32 math."""
    s = state_dim
    # sigmoid(x) == 0.5*tanh(0.5*x) + 0.5  -> 1 EUP push/elem (vs exp+recip),
    # applied once to the contiguous [forget | update] 2S-wide slab.
    gates = 0.5 * jnp.tanh(0.5 * y[:, :2 * s]) + 0.5
    forget_gate = gates[:, :s]
    update_gate = gates[:, s:]
    update_data = jnp.maximum(y[:, 2 * s:], 0.0)          # relu activation
    new_state = prev.astype(jnp.float32) * forget_gate + update_data * update_gate
    out_ref[...] = new_state.astype(out_ref.dtype)


def gate_kernel_fused(prev_ref, upd_ref, w_ref, b_ref, out_ref, *, state_dim):
    # prev_ref: (TM, S)  upd_ref: (TM, U)  w_ref: (S+U, 3S)  b_ref: (1, 3S)
    prev = prev_ref[...]
    upd = upd_ref[...]
    # In-kernel concat -> single K=(S+U) matmul: fills the 256-deep MXU on
    # v6e/v7x and removes the (TM,3S) f32 add of the two-dot form.
    x = jnp.concatenate([prev, upd], axis=-1)
    y = jnp.dot(x, w_ref[...], preferred_element_type=jnp.float32)
    y = y + b_ref[...].astype(jnp.float32)
    _gate_epilogue(prev, y, state_dim, out_ref)


def gate_kernel_split(prev_ref, upd_ref, wp_ref, wu_ref, b_ref, out_ref, *,
                      state_dim):
    # v5e form: 128x128 MXU -> K=128 already fills the systolic depth; the
    # in-kernel concat copy would be wasted VMEM traffic there.
    prev = prev_ref[...]
    upd = upd_ref[...]
    y = jnp.dot(prev, wp_ref[...], preferred_element_type=jnp.float32)
    y = y + jnp.dot(upd, wu_ref[...], preferred_element_type=jnp.float32)
    y = y + b_ref[...].astype(jnp.float32)
    _gate_epilogue(prev, y, state_dim, out_ref)


# ----------------------------------------------------------------------------
# Wrapper
# ----------------------------------------------------------------------------

def _default_fuse_k():
    """Fuse to a single K=(S+U) dot on 256-deep-MXU chips (v6e/v7x)."""
    try:
        kind = jax.devices()[0].device_kind.lower()
    except Exception:
        return True
    return not any(t in kind for t in ("v2", "v3", "v4", "v5"))


def _vmem_limit_bytes(tm_eff, state_dim, update_dim, act_dtype, w_dtype,
                      fused, single_buffer_weights):
    """Scoped-VMEM budget: row tiles (x2 buffers) + weights + f32 temporaries."""
    isz = jnp.dtype(act_dtype).itemsize
    wsz = jnp.dtype(w_dtype).itemsize
    din = state_dim + update_dim
    rows = 2 * tm_eff * (2 * state_dim + update_dim) * isz   # prev+upd+out, double-buffered
    wbuf = 1 if single_buffer_weights else 2
    weights = wbuf * (din * 3 * state_dim + 3 * state_dim) * wsz
    # f32 kernel intermediates: concat x (fused only), y (TM,3S), gate slabs.
    interm = tm_eff * ((din if fused else 0) + 5 * state_dim) * 4
    est = rows + weights + interm
    # 2x headroom for compiler temporaries; stay within every chip's physical VMEM.
    return int(min(64 * 1024 * 1024, max(32 * 1024 * 1024, 2 * est)))


def gate_forward(previous_state, state_update, w_prev, w_upd, b_stacked, *,
                 tm=1024, fuse_k=None):
    """Gate forward.  previous_state: [..., S], state_update: [..., U] -> [..., S].

    Recommended calling convention: bf16 activations + bf16 weights + bf16
    output (accumulation is always f32 via preferred_element_type); this
    halves HBM traffic on the mem-bound v5e/v6e paths and is what makes the
    K=256 MXU fusion pay off on v6e/v7x.
    """
    assert previous_state.ndim == state_update.ndim
    assert previous_state.shape[:-1] == state_update.shape[:-1]
    state_dim = previous_state.shape[-1]
    update_dim = state_update.shape[-1]
    assert w_prev.shape == (state_dim, 3 * state_dim)
    assert w_upd.shape == (update_dim, 3 * state_dim)
    assert b_stacked.shape == (3 * state_dim,)
    # Lane-aligned gate slices / lane-dense output stores.
    assert state_dim % 128 == 0, "state_dim must be a multiple of 128"

    if fuse_k is None:
        fuse_k = _default_fuse_k()

    lead_shape = previous_state.shape[:-1]
    m = 1
    for d in lead_shape:
        m *= d

    prev2d = previous_state.reshape(m, state_dim)
    upd2d = state_update.reshape(m, update_dim)
    b2d = b_stacked.reshape(1, 3 * state_dim)
    din = state_dim + update_dim

    # Row-tile size: multiple of 8 (sublane), or the full extent when M is small.
    if m <= tm:
        tm_eff = m
    else:
        tm_eff = max(8, (tm // 8) * 8)
    grid = (pl.cdiv(m, tm_eff),)

    row_spec_prev = pl.BlockSpec((tm_eff, state_dim), lambda i: (i, 0))
    row_spec_upd = pl.BlockSpec((tm_eff, update_dim), lambda i: (i, 0))
    out_spec = pl.BlockSpec((tm_eff, state_dim), lambda i: (i, 0))

    if fuse_k:
        # One stacked (S+U, 3S) weight for the single K=(S+U) dot.
        w_all = jnp.concatenate([w_prev, w_upd], axis=0)
        kernel = functools.partial(gate_kernel_fused, state_dim=state_dim)
        weight_arrays = (w_all, b2d)
        weight_shapes = [(din, 3 * state_dim), (1, 3 * state_dim)]
    else:
        kernel = functools.partial(gate_kernel_split, state_dim=state_dim)
        weight_arrays = (w_prev, w_upd, b2d)
        weight_shapes = [(state_dim, 3 * state_dim),
                         (update_dim, 3 * state_dim),
                         (1, 3 * state_dim)]

    act_itemsize = jnp.dtype(previous_state.dtype).itemsize
    w_itemsize = jnp.dtype(w_prev.dtype).itemsize
    cost = pl.CostEstimate(
        flops=int(2 * m * din * 3 * state_dim),
        transcendentals=int(2 * m * state_dim),   # one tanh per gate element
        bytes_accessed=int(m * (2 * state_dim + update_dim) * act_itemsize
                           + (din * 3 * state_dim + 3 * state_dim) * w_itemsize),
    )

    def run(single_buffer_weights):
        # Grid-invariant weights/bias: single-buffered (halves their VMEM).
        kw = ({"pipeline_mode": pl.Buffered(1)} if single_buffer_weights else {})
        w_specs = [pl.BlockSpec(shape, lambda i: (0, 0), **kw)
                   for shape in weight_shapes]
        vmem_limit = _vmem_limit_bytes(tm_eff, state_dim, update_dim,
                                       previous_state.dtype, w_prev.dtype,
                                       fuse_k, single_buffer_weights)
        call = pl.pallas_call(
            kernel,
            out_shape=jax.ShapeDtypeStruct((m, state_dim), previous_state.dtype),
            grid=grid,
            in_specs=[row_spec_prev, row_spec_upd, *w_specs],
            out_specs=out_spec,
            compiler_params=pltpu.CompilerParams(
                dimension_semantics=("parallel",),      # megacore sharding on v7x
                vmem_limit_bytes=vmem_limit),
            cost_estimate=cost,
        )
        return call(prev2d, upd2d, *weight_arrays)

    try:
        out2d = run(True)
    except Exception:
        # pl.Buffered(1) not supported on this jax/Mosaic build -> default buffering.
        out2d = run(False)

    return out2d.reshape(*lead_shape, state_dim)


# ----------------------------------------------------------------------------
# Params / reference
# ----------------------------------------------------------------------------

def init_gate_params(key, state_dim, update_dim, dtype=jnp.float32):
    """nn.Linear-style init: U(-1/sqrt(fan_in), 1/sqrt(fan_in)).

    Returns w_prev (S, 3S), w_upd (U, 3S) and b (3S,), where the 3S columns
    are [forget | update | project].
    """
    din = state_dim + update_dim
    bound = 1.0 / jnp.sqrt(jnp.float32(din))
    keys = jax.random.split(key, 6)
    wps, wus, bs = [], [], []
    for i in range(3):
        w = jax.random.uniform(keys[2 * i], (din, state_dim),
                               minval=-bound, maxval=bound, dtype=dtype)
        b = jax.random.uniform(keys[2 * i + 1], (state_dim,),
                               minval=-bound, maxval=bound, dtype=dtype)
        wps.append(w[:state_dim])
        wus.append(w[state_dim:])
        bs.append(b)
    w_prev = jnp.concatenate(wps, axis=-1)    # (S, 3S)
    w_upd = jnp.concatenate(wus, axis=-1)     # (U, 3S)
    b_stacked = jnp.concatenate(bs, axis=-1)  # (3S,)
    return w_prev, w_upd, b_stacked


def gate_reference(previous_state, state_update, w_prev, w_upd, b_stacked):
    """Pure-JAX reference matching the PyTorch forward semantics."""
    s = previous_state.shape[-1]
    y = previous_state @ w_prev + state_update @ w_upd + b_stacked
    f = jax.nn.sigmoid(y[..., 0 * s:1 * s])
    u = jax.nn.sigmoid(y[..., 1 * s:2 * s])
    d = jnp.maximum(y[..., 2 * s:3 * s], 0.0)
    return previous_state * f + d * u


if __name__ == "__main__":
    state_dim = 128
    update_dim = 128

    key = jax.random.PRNGKey(0)
    k_prev, k_upd, k_params = jax.random.split(key, 3)
    w_prev, w_upd, b_stacked = init_gate_params(k_params, state_dim, update_dim)

    # --- f32 path, small shape (single tile), auto MXU-fusion choice ---
    batch, seq = 2, 8
    previous_state = jax.random.normal(k_prev, (batch, seq, state_dim),
                                       dtype=jnp.float32)
    state_update = jax.random.normal(k_upd, (batch, seq, update_dim),
                                     dtype=jnp.float32)
    out = gate_forward(previous_state, state_update, w_prev, w_upd, b_stacked)
    out = jax.block_until_ready(out)
    ref = gate_reference(previous_state, state_update, w_prev, w_upd, b_stacked)
    assert out.shape == previous_state.shape
    assert jnp.allclose(out, ref, atol=1e-5, rtol=1e-5), "f32 mismatch vs reference"

    # --- f32, M > TM with a partial last tile (exercises pipelining/masking) ---
    k_prev2, k_upd2 = jax.random.split(jax.random.PRNGKey(1))
    prev_big = jax.random.normal(k_prev2, (5, 130, state_dim), dtype=jnp.float32)
    upd_big = jax.random.normal(k_upd2, (5, 130, update_dim), dtype=jnp.float32)
    out_big = gate_forward(prev_big, upd_big, w_prev, w_upd, b_stacked, tm=512)
    out_big = jax.block_until_ready(out_big)
    ref_big = gate_reference(prev_big, upd_big, w_prev, w_upd, b_stacked)
    assert jnp.allclose(out_big, ref_big, atol=1e-5, rtol=1e-5), \
        "tiled f32 mismatch vs reference"

    # --- explicit split (two-dot, v5e-style) path to cover both kernel bodies ---
    out_split = gate_forward(previous_state, state_update, w_prev, w_upd,
                             b_stacked, fuse_k=False)
    out_split = jax.block_until_ready(out_split)
    assert jnp.allclose(out_split, ref, atol=1e-5, rtol=1e-5), \
        "split-kernel f32 mismatch vs reference"

    # --- bf16 path (recommended convention: MXU-native operands, f32 acc) ---
    prev_bf = previous_state.astype(jnp.bfloat16)
    upd_bf = state_update.astype(jnp.bfloat16)
    out_bf = gate_forward(prev_bf, upd_bf,
                          w_prev.astype(jnp.bfloat16),
                          w_upd.astype(jnp.bfloat16),
                          b_stacked.astype(jnp.bfloat16))
    out_bf = jax.block_until_ready(out_bf)
    assert out_bf.dtype == jnp.bfloat16
    assert jnp.allclose(out_bf.astype(jnp.float32), ref, atol=1e-1, rtol=1e-1), \
        "bf16 mismatch vs f32 reference"

    # Dropout layer is constructed but unused in the PyTorch forward -> omitted.
    print("KERNEL_OK")
</pallas_src>

<mosaic_0001>
module attributes {stable_mosaic.version = 11 : i64} {
  func.func @gate_kernel_fused(%arg0: i32, %arg1: memref<16x128xf32, #tpu.memory_space<vmem>>, %arg2: memref<16x128xf32, #tpu.memory_space<vmem>>, %arg3: memref<256x384xf32, #tpu.memory_space<vmem>>, %arg4: memref<1x384xf32, #tpu.memory_space<vmem>>, %arg5: memref<16x128xf32, #tpu.memory_space<vmem>>) attributes {dimension_semantics = [#tpu.dimension_semantics<parallel>], iteration_bounds = array<i64: 1>, scalar_prefetch = 0 : i64, scratch_operands = 0 : i64, tpu.core_type = #tpu.core_type<tc>, window_params = [{transform_indices = @transform_0, window_bounds = array<i64: 16, 128>}, {transform_indices = @transform_1, window_bounds = array<i64: 16, 128>}, {pipeline_mode = #tpu.pipeline_mode<synchronous>, transform_indices = @transform_2, window_bounds = array<i64: 256, 384>}, {pipeline_mode = #tpu.pipeline_mode<synchronous>, transform_indices = @transform_3, window_bounds = array<i64: 1, 384>}, {transform_indices = @transform_4, window_bounds = array<i64: 16, 128>}]} {
    %c0 = arith.constant 0 : index
    %c0_0 = arith.constant 0 : index
    %0 = vector.load %arg1[%c0, %c0_0] : memref<16x128xf32, #tpu.memory_space<vmem>>, vector<16x128xf32>
    %c0_1 = arith.constant 0 : index
    %c0_2 = arith.constant 0 : index
    %1 = vector.load %arg2[%c0_1, %c0_2] : memref<16x128xf32, #tpu.memory_space<vmem>>, vector<16x128xf32>
    %2 = tpu.concatenate %0, %1 in 1 : vector<16x128xf32>, vector<16x128xf32> -> vector<16x256xf32>
    %c0_3 = arith.constant 0 : index
    %c0_4 = arith.constant 0 : index
    %3 = vector.load %arg3[%c0_3, %c0_4] : memref<256x384xf32, #tpu.memory_space<vmem>>, vector<256x384xf32>
    %cst = arith.constant dense<0.000000e+00> : vector<16x384xf32>
    %4 = tpu.matmul %2, %3, %cst {dimension_numbers = #tpu.dot_dimension_numbers<[1], [0], [0], [1], [0, 0, 1, 1], [], []>} : vector<16x256xf32>, vector<256x384xf32>, vector<16x384xf32> -> vector<16x384xf32>
    %c0_5 = arith.constant 0 : index
    %c0_6 = arith.constant 0 : index
    %5 = vector.load %arg4[%c0_5, %c0_6] : memref<1x384xf32, #tpu.memory_space<vmem>>, vector<1x384xf32>
    %6 = vector.broadcast %5 : vector<1x384xf32> to vector<16x384xf32>
    %7 = arith.addf %4, %6 : vector<16x384xf32>
    %8 = vector.extract_strided_slice %7 {offsets = [0, 0], sizes = [16, 256], strides = [1, 1]} : vector<16x384xf32> to vector<16x256xf32>
    %cst_7 = arith.constant 5.000000e-01 : f32
    %9 = vector.broadcast %cst_7 : f32 to vector<16x256xf32>
    %10 = arith.mulf %9, %8 : vector<16x256xf32>
    %11 = math.tanh %10 : vector<16x256xf32>
    %cst_8 = arith.constant 5.000000e-01 : f32
    %12 = vector.broadcast %cst_8 : f32 to vector<16x256xf32>
    %13 = arith.mulf %12, %11 : vector<16x256xf32>
    %cst_9 = arith.constant 5.000000e-01 : f32
    %14 = vector.broadcast %cst_9 : f32 to vector<16x256xf32>
    %15 = arith.addf %13, %14 : vector<16x256xf32>
    %16 = vector.extract_strided_slice %15 {offsets = [0, 0], sizes = [16, 128], strides = [1, 1]} : vector<16x256xf32> to vector<16x128xf32>
    %17 = vector.extract_strided_slice %15 {offsets = [0, 128], sizes = [16, 128], strides = [1, 1]} : vector<16x256xf32> to vector<16x128xf32>
    %18 = vector.extract_strided_slice %7 {offsets = [0, 256], sizes = [16, 128], strides = [1, 1]} : vector<16x384xf32> to vector<16x128xf32>
    %cst_10 = arith.constant 0.000000e+00 : f32
    %19 = vector.broadcast %cst_10 : f32 to vector<16x128xf32>
    %20 = arith.maximumf %18, %19 : vector<16x128xf32>
    %21 = arith.mulf %0, %16 : vector<16x128xf32>
    %22 = arith.mulf %20, %17 : vector<16x128xf32>
    %23 = arith.addf %21, %22 : vector<16x128xf32>
    %c0_11 = arith.constant 0 : index
    %c0_12 = arith.constant 0 : index
    %24 = vector.load %arg5[%c0_11, %c0_12] : memref<16x128xf32, #tpu.memory_space<vmem>>, vector<16x128xf32>
    tpu.vector_store %arg5[%c0_11, %c0_12], %23 {strides = array<i32>} : memref<16x128xf32, #tpu.memory_space<vmem>>, vector<16x128xf32>,
    return
  }
  func.func @transform_0(%arg0: i32) -> (i32, i32) {
    %c0_i32 = arith.constant 0 : i32
    %c0_i32_0 = arith.constant 0 : i32
    return %arg0, %c0_i32 : i32, i32
  }
  func.func @transform_1(%arg0: i32) -> (i32, i32) {
    %c0_i32 = arith.constant 0 : i32
    %c0_i32_0 = arith.constant 0 : i32
    return %arg0, %c0_i32 : i32, i32
  }
  func.func @transform_2(%arg0: i32) -> (i32, i32) {
    %c0_i32 = arith.constant 0 : i32
    %c0_i32_0 = arith.constant 0 : i32
    %c0_i32_1 = arith.constant 0 : i32
    return %c0_i32, %c0_i32_0 : i32, i32
  }
  func.func @transform_3(%arg0: i32) -> (i32, i32) {
    %c0_i32 = arith.constant 0 : i32
    %c0_i32_0 = arith.constant 0 : i32
    %c0_i32_1 = arith.constant 0 : i32
    return %c0_i32, %c0_i32_0 : i32, i32
  }
  func.func @transform_4(%arg0: i32) -> (i32, i32) {
    %c0_i32 = arith.constant 0 : i32
    %c0_i32_0 = arith.constant 0 : i32
    return %arg0, %c0_i32 : i32, i32
  }
}

module attributes {stable_mosaic.version = 11 : i64} {
  func.func @gate_kernel_fused(%arg0: i32, %arg1: memref<16x128xf32, #tpu.memory_space<vmem>>, %arg2: memref<16x128xf32, #tpu.memory_space<vmem>>, %arg3: memref<256x384xf32, #tpu.memory_space<vmem>>, %arg4: memref<1x384xf32, #tpu.memory_space<vmem>>, %arg5: memref<16x128xf32, #tpu.memory_space<vmem>>) attributes {dimension_semantics = [#tpu.dimension_semantics<parallel>], iteration_bounds = array<i64: 1>, scalar_prefetch = 0 : i64, scratch_operands = 0 : i64, tpu.core_type = #tpu.core_type<tc>, window_params = [{transform_indices = @transform_0, window_bounds = array<i64: 16, 128>}, {transform_indices = @transform_1, window_bounds = array<i64: 16, 128>}, {pipeline_mode = #tpu.pipeline_mode<synchronous>, transform_indices = @transform_2, window_bounds = array<i64: 256, 384>}, {pipeline_mode = #tpu.pipeline_mode<synchronous>, transform_indices = @transform_3, window_bounds = array<i64: 1, 384>}, {transform_indices = @transform_4, window_bounds = array<i64: 16, 128>}]} {
    %c0 = arith.constant 0 : index
    %c0_0 = arith.constant 0 : index
    %0 = vector.load %arg1[%c0, %c0_0] : memref<16x128xf32, #tpu.memory_space<vmem>>, vector<16x128xf32>
    %c0_1 = arith.constant 0 : index
    %c0_2 = arith.constant 0 : index
    %1 = vector.load %arg2[%c0_1, %c0_2] : memref<16x128xf32, #tpu.memory_space<vmem>>, vector<16x128xf32>
    %2 = tpu.concatenate %0, %1 in 1 : vector<16x128xf32>, vector<16x128xf32> -> vector<16x256xf32>
    %c0_3 = arith.constant 0 : index
    %c0_4 = arith.constant 0 : index
    %3 = vector.load %arg3[%c0_3, %c0_4] : memref<256x384xf32, #tpu.memory_space<vmem>>, vector<256x384xf32>
    %cst = arith.constant dense<0.000000e+00> : vector<16x384xf32>
    %4 = tpu.matmul %2, %3, %cst {dimension_numbers = #tpu.dot_dimension_numbers<[1], [0], [0], [1], [0, 0, 1, 1], [], []>} : vector<16x256xf32>, vector<256x384xf32>, vector<16x384xf32> -> vector<16x384xf32>
    %c0_5 = arith.constant 0 : index
    %c0_6 = arith.constant 0 : index
    %5 = vector.load %arg4[%c0_5, %c0_6] : memref<1x384xf32, #tpu.memory_space<vmem>>, vector<1x384xf32>
    %6 = vector.broadcast %5 : vector<1x384xf32> to vector<16x384xf32>
    %7 = arith.addf %4, %6 : vector<16x384xf32>
    %8 = vector.extract_strided_slice %7 {offsets = [0, 0], sizes = [16, 256], strides = [1, 1]} : vector<16x384xf32> to vector<16x256xf32>
    %cst_7 = arith.constant 5.000000e-01 : f32
    %9 = vector.broadcast %cst_7 : f32 to vector<16x256xf32>
    %10 = arith.mulf %9, %8 : vector<16x256xf32>
    %11 = math.tanh %10 : vector<16x256xf32>
    %cst_8 = arith.constant 5.000000e-01 : f32
    %12 = vector.broadcast %cst_8 : f32 to vector<16x256xf32>
    %13 = arith.mulf %12, %11 : vector<16x256xf32>
    %cst_9 = arith.constant 5.000000e-01 : f32
    %14 = vector.broadcast %cst_9 : f32 to vector<16x256xf32>
    %15 = arith.addf %13, %14 : vector<16x256xf32>
    %16 = vector.extract_strided_slice %15 {offsets = [0, 0], sizes = [16, 128], strides = [1, 1]} : vector<16x256xf32> to vector<16x128xf32>
    %17 = vector.extract_strided_slice %15 {offsets = [0, 128], sizes = [16, 128], strides = [1, 1]} : vector<16x256xf32> to vector<16x128xf32>
    %18 = vector.extract_strided_slice %7 {offsets = [0, 256], sizes = [16, 128], strides = [1, 1]} : vector<16x384xf32> to vector<16x128xf32>
    %cst_10 = arith.constant 0.000000e+00 : f32
    %19 = vector.broadcast %cst_10 : f32 to vector<16x128xf32>
    %20 = arith.maximumf %18, %19 : vector<16x128xf32>
    %21 = arith.mulf %0, %16 : vector<16x128xf32>
    %22 = arith.mulf %20, %17 : vector<16x128xf32>
    %23 = arith.addf %21, %22 : vector<16x128xf32>
    %c0_11 = arith.constant 0 : index
    %c0_12 = arith.constant 0 : index
    %24 = vector.load %arg5[%c0_11, %c0_12] : memref<16x128xf32, #tpu.memory_space<vmem>>, vector<16x128xf32>
    tpu.vector_store %arg5[%c0_11, %c0_12], %23 {strides = array<i32>} : memref<16x128xf32, #tpu.memory_space<vmem>>, vector<16x128xf32>,
    return
  }
  func.func @transform_0(%arg0: i32) -> (i32, i32) {
    %c0_i32 = arith.constant 0 : i32
    %c0_i32_0 = arith.constant 0 : i32
    return %arg0, %c0_i32 : i32, i32
  }
  func.func @transform_1(%arg0: i32) -> (i32, i32) {
    %c0_i32 = arith.constant 0 : i32
    %c0_i32_0 = arith.constant 0 : i32
    return %arg0, %c0_i32 : i32, i32
  }
  func.func @transform_2(%arg0: i32) -> (i32, i32) {
    %c0_i32 = arith.constant 0 : i32
    %c0_i32_0 = arith.constant 0 : i32
    %c0_i32_1 = arith.constant 0 : i32
    return %c0_i32, %c0_i32_0 : i32, i32
  }
  func.func @transform_3(%arg0: i32) -> (i32, i32) {
    %c0_i32 = arith.constant 0 : i32
    %c0_i32_0 = arith.constant 0 : i32
    %c0_i32_1 = arith.constant 0 : i32
    return %c0_i32, %c0_i32_0 : i32, i32
  }
  func.func @transform_4(%arg0: i32) -> (i32, i32) {
    %c0_i32 = arith.constant 0 : i32
    %c0_i32_0 = arith.constant 0 : i32
    return %arg0, %c0_i32 : i32, i32
  }
}

</mosaic_0001>

<bundles_post_ra>
// kernel: tpu_custom_call.1
= control target key start
LH: loop header
LB: loop body
LE: loop exit
PB: predicated region body
PF: predicated region fallthrough
CT: control target
= control target key end

     0   :  { %9 = vsyncpa [#allocation3], 0  ;;  %s726_s0 = inlined_call_operand.hbm [shape: f32[16,128], index: 0, kind: input, shape index: {}]   ;;  %s727_s1 = inlined_call_operand.hbm [shape: f32[16,128], index: 1, kind: input, shape index: {}]   ;;  %s728_s2 = inlined_call_operand.hbm [shape: f32[256,384], index: 2, kind: input, shape index: {}]   ;;  %s729_s3 = inlined_call_operand.vmem [shape: f32[1,384], index: 3, kind: input, shape index: {}]   ;;  %s730_s4 = inlined_call_operand.hbm [shape: f32[16,128], index: 4, kind: output, shape index: {}]  }
   0x1   :  { %10 = vsyncpa [#allocation6], 0 }
   0x2   :  { %11 = vsyncpa [#allocation4], 0  ;;  %s616_s15 = smov [#allocation5]   ;;  %s617_s17 = smov [#allocation2]  }
   0x3   :  { %s29_s16 = sshll.u32 %s616_s15, 4  ;;  %s17_s18 = sshll.u32 %s617_s17, 4  ;;  %s30_s16 = int_to_ptr.vmem [resolvable:$true] %s29_s16  ;;  %s649_s18 = int_to_ptr.vmem [resolvable:$true] %s17_s18 }
   0x4   :  { %s522_s21 = scalar_lea.hbm %s727_s1, 256 }
   0x5   :  { %p523_p0 = scmp.ne.s32.totalorder %s727_s1, %s522_s21  ;;  %p526_p1 = scmp.lt.u32.totalorder %s522_s21, %s727_s1 }
   0x7   :  { %p528_p2 = pnand %p526_p1, %p523_p0 }
   0x9   :  { %531 = shalt.err (!%p528_p2)
}
   0xa   :  { %s532_s26 = scalar_lea.vmem %s30_s16, 256  ;;  %p537_p4 = scmp.lt.s32.totalorder %s30_s16, %s30_s16 }
   0xb   :  { %p533_p3 = scmp.ne.s32.totalorder %s30_s16, %s532_s26  ;;  %p538_p5 = scmp.lt.s32.totalorder %s532_s26, %s532_s26 }
   0xd   :  { %p539_p6 = por %p538_p5, %p537_p4 }
   0xf   :  { %p540_p7 = pnand %p539_p6, %p533_p3 }
  0x11   :  { %543 = shalt.err (!%p540_p7)
}
  0x12   :  { %s618_s27 = smov 128   ;;  %s619_s28 = smov 8  }
  0x13   :  { %35 = dma.hbm_to_vmem [thread:$0]  %s727_s1, 256, %s30_s16, [#allocation6], %s618_s27, %s618_s27, %s619_s28  }
  0x14   :  { %s544_s7 = scalar_lea.hbm %s726_s0, 256 }
  0x15   :  { %p545_p8 = scmp.ne.s32.totalorder %s726_s0, %s544_s7  ;;  %p548_p9 = scmp.lt.u32.totalorder %s544_s7, %s726_s0 }
  0x17   :  { %p550_p10 = pnand %p548_p9, %p545_p8 }
  0x19   :  { %553 = shalt.err (!%p550_p10)
}
  0x1a   :  { %s554_s12 = scalar_lea.vmem %s649_s18, 256  ;;  %p559_p12 = scmp.lt.s32.totalorder %s649_s18, %s649_s18 }
  0x1b   :  { %p555_p11 = scmp.ne.s32.totalorder %s649_s18, %s554_s12  ;;  %p560_p13 = scmp.lt.s32.totalorder %s554_s12, %s554_s12 }
  0x1d   :  { %p561_p0 = por %p560_p13, %p559_p12 }
  0x1f   :  { %p562_p1 = pnand %p561_p0, %p555_p11 }
  0x21   :  { %565 = shalt.err (!%p562_p1)
}
  0x22   :  { %23 = dma.hbm_to_vmem [thread:$0]  %s726_s0, 256, %s649_s18, [#allocation3], %s618_s27, %s618_s27, %s619_s28  }
  0x23   :  { %s620_s14 = smov [#allocation7]   ;;  %s566_s19 = scalar_lea.hbm %s728_s2, 12288 }
  0x24   :  { %s41_s15 = sshll.u32 %s620_s14, 4  ;;  %p567_p2 = scmp.ne.s32.totalorder %s728_s2, %s566_s19  ;;  %s42_s15 = int_to_ptr.vmem [resolvable:$true] %s41_s15 }
  0x25   :  { %p570_p3 = scmp.lt.u32.totalorder %s566_s19, %s728_s2 }
  0x27   :  { %p572_p4 = pnand %p570_p3, %p567_p2 }
  0x29   :  { %575 = shalt.err (!%p572_p4)
}
  0x2a   :  { %s576_s24 = scalar_lea.vmem %s42_s15, 12288  ;;  %p581_p6 = scmp.lt.s32.totalorder %s42_s15, %s42_s15 }
  0x2b   :  { %p577_p5 = scmp.ne.s32.totalorder %s42_s15, %s576_s24  ;;  %p582_p7 = scmp.lt.s32.totalorder %s576_s24, %s576_s24 }
  0x2d   :  { %p583_p8 = por %p582_p7, %p581_p6 }
  0x2f   :  { %p584_p9 = pnand %p583_p8, %p577_p5 }
  0x31   :  { %587 = shalt.err (!%p584_p9)
}
  0x32   :  { %s621_s0 = smov 384   ;;  %s622_s18 = smov 24  }
  0x33   :  { %47 = dma.hbm_to_vmem [thread:$0]  %s728_s2, 12288, %s42_s15, [#allocation6], %s621_s0, %s621_s0, %s622_s18  }
  0x34   :  { %610 = dma.done.wait [#allocation3], 256  }
  0x35   :  { %611 = vsyncadd [#allocation3], 4294967040 }
  0x36   :  { %612 = dma.done.wait [#allocation6], 12544  }
  0x37   :  { %613 = vsyncadd [#allocation6], 4294954752  ;;  %v64_v0 = vld [vmem:[#allocation7 + $0x8] sm:$0xff]  ;;  %v67_v1 = vld [vmem:[#allocation7 + $0x20] sm:$0xff] }
  0x38   :  { %v63_v2 = vld [vmem:[#allocation7] sm:$0xff]  ;;  %v410_v3 = vpack.c.bf16 %v67_v1, %v64_v0  ;;  %v66_v4 = vld [vmem:[#allocation7 + $0x18] sm:$0xff]  ;;  %v73_v6 = vld [vmem:[#allocation7 + $0x50] sm:$0xff] }
  0x39   :  { %v70_v5 = vld [vmem:[#allocation7 + $0x38] sm:$0xff]  ;;  %v412_v7 = vpack.c.bf16 %v66_v4, %v63_v2  ;;  %v69_v9 = vld [vmem:[#allocation7 + $0x30] sm:$0xff]  ;;  %v72_v10 = vld [vmem:[#allocation7 + $0x48] sm:$0xff] }
  0x3a   :  { %v414_v8 = vpack.c.bf16 %v73_v6, %v70_v5  ;;  %v76_v11 = vld [vmem:[#allocation7 + $0x68] sm:$0xff]  ;;  %411 = vmatprep.subr.bf16.mxu0 %v410_v3  ;;  %v79_v12 = vld [vmem:[#allocation7 + $0x80] sm:$0xff]  ;;  %v416_v13 = vpack.c.bf16 %v72_v10, %v69_v9  ;;  %v78_v16 = vld [vmem:[#allocation7 + $0x78] sm:$0xff] }
  0x3b   :  { %413 = vmatpush1.bf16.msra.mxu0 %v412_v7  ;;  %v418_v14 = vpack.c.bf16 %v79_v12, %v76_v11  ;;  %v75_v15 = vld [vmem:[#allocation7 + $0x60] sm:$0xff]  ;;  %v82_v17 = vld [vmem:[#allocation7 + $0x98] sm:$0xff]  ;;  %v85_v18 = vld [vmem:[#allocation7 + $0xb0] sm:$0xff] }
  0x3c   :  { %415 = vmatprep.subr.bf16.mxu0 %v414_v8  ;;  %v420_v19 = vpack.c.bf16 %v78_v16, %v75_v15  ;;  %v422_v20 = vpack.c.bf16 %v85_v18, %v82_v17  ;;  %v81_v21 = vld [vmem:[#allocation7 + $0x90] sm:$0xff]  ;;  %v84_v22 = vld [vmem:[#allocation7 + $0xa8] sm:$0xff]  ;;  %v91_v24 = vld [vmem:[#allocation7 + $0xe0] sm:$0xff] }
  0x3d   :  { %v88_v23 = vld [vmem:[#allocation7 + $0xc8] sm:$0xff]  ;;  %v424_v25 = vpack.c.bf16 %v84_v22, %v81_v21  ;;  %v87_v27 = vld [vmem:[#allocation7 + $0xc0] sm:$0xff]  ;;  %v90_v28 = vld [vmem:[#allocation7 + $0xd8] sm:$0xff] }
  0x3e   :  { %v426_v26 = vpack.c.bf16 %v91_v24, %v88_v23  ;;  %v94_v29 = vld [vmem:[#allocation7 + $0xf8] sm:$0xff]  ;;  %v97_v30 = vld [vmem:[#allocation7 + $0x110] sm:$0xff]  ;;  %v116_v32 = vld [vmem:[#allocation7 + $0x1a8] sm:$0xff]  ;;  %v428_v33 = vpack.c.bf16 %v90_v28, %v87_v27 }
  0x3f   :  { %417 = vmatpush1.bf16.msra.mxu0 %v416_v13  ;;  %v113_v31 = vld [vmem:[#allocation7 + $0x190] sm:$0xff]  ;;  %v430_v37 = vpack.c.bf16 %v97_v30, %v94_v29  ;;  %v96_v38 = vld [vmem:[#allocation7 + $0x108] sm:$0xff]  ;;  %v103_v41 = vld [vmem:[#allocation7 + $0x140] sm:$0xff] }
  0x40   :  { %419 = vmatprep.subr.bf16.mxu0 %v418_v14  ;;  %v93_v34 = vld [vmem:[#allocation7 + $0xf0] sm:$0xff]  ;;  %v474_v35 = vpack.c.bf16 %v116_v32, %v113_v31  ;;  %v100_v39 = vld [vmem:[#allocation7 + $0x128] sm:$0xff]  ;;  %v119_v43 = vld [vmem:[#allocation7 + $0x1c0] sm:$0xff] }
  0x41   :  { %v65_v36 = vld [vmem:[#allocation7 + $0x10] sm:$0xff]  ;;  %v68_v40 = vld [vmem:[#allocation7 + $0x28] sm:$0xff]  ;;  %v122_v44 = vld [vmem:[#allocation7 + $0x1d8] sm:$0xff]  ;;  %v432_v48 = vpack.c.bf16 %v96_v38, %v93_v34  ;;  %v434_v52 = vpack.c.bf16 %v103_v41, %v100_v39 }
  0x42   :  { %475 = vmatprep.subr.bf16.mxu1 %v474_v35  ;;  %v476_v42 = vpack.c.bf16 %v68_v40, %v65_v36  ;;  %v478_v45 = vpack.c.bf16 %v122_v44, %v119_v43  ;;  %v71_v46 = vld [vmem:[#allocation7 + $0x40] sm:$0xff]  ;;  %v74_v47 = vld [vmem:[#allocation7 + $0x58] sm:$0xff]  ;;  %v125_v51 = vld [vmem:[#allocation7 + $0x1f0] sm:$0xff] }
  0x43   :  { %421 = vmatpush1.bf16.msra.mxu0 %v420_v19  ;;  %v99_v49 = vld [vmem:[#allocation7 + $0x120] sm:$0xff]  ;;  %v480_v50 = vpack.c.bf16 %v74_v47, %v71_v46  ;;  %v102_v53 = vld [vmem:[#allocation7 + $0x138] sm:$0xff]  ;;  %v128_v55 = vld [vmem:[#allocation7 + $0x208] sm:$0xff] }
  0x44   :  { %423 = vmatprep.subr.bf16.mxu0 %v422_v20  ;;  %477 = vmatpush3.bf16.msra.mxu1 %v476_v42  ;;  %v106_v54 = vld [vmem:[#allocation7 + $0x158] sm:$0xff]  ;;  %v109_v56 = vld [vmem:[#allocation7 + $0x170] sm:$0xff]  ;;  %v482_v57 = vpack.c.bf16 %v128_v55, %v125_v51  ;;  %v80_v59 = vld [vmem:[#allocation7 + $0x88] sm:$0xff]  ;;  %v436_v62 = vpack.c.bf16 %v102_v53, %v99_v49 }
  0x45   :  { %479 = vmatprep.subr.bf16.mxu1 %v478_v45  ;;  %v77_v58 = vld [vmem:[#allocation7 + $0x70] sm:$0xff]  ;;  %v131_v60 = vld [vmem:[#allocation7 + $0x220] sm:$0xff]  ;;  %v134_v61 = vld [vmem:[#allocation7 + $0x238] sm:$0xff]  ;;  %v438_v2 = vpack.c.bf16 %v109_v56, %v106_v54 }
  0x46   :  { %v105_v63 = vld [vmem:[#allocation7 + $0x150] sm:$0xff]  ;;  %v108_v0 = vld [vmem:[#allocation7 + $0x168] sm:$0xff]  ;;  %v484_v1 = vpack.c.bf16 %v80_v59, %v77_v58  ;;  %v486_v4 = vpack.c.bf16 %v134_v61, %v131_v60  ;;  %v83_v5 = vld [vmem:[#allocation7 + $0xa0] sm:$0xff] }
  0x47   :  { %425 = vmatpush1.bf16.msra.mxu0 %v424_v25  ;;  %v112_v3 = vld [vmem:[#allocation7 + $0x188] sm:$0xff]  ;;  %v86_v6 = vld [vmem:[#allocation7 + $0xb8] sm:$0xff]  ;;  %v115_v7 = vld [vmem:[#allocation7 + $0x1a0] sm:$0xff]  ;;  %v440_v10 = vpack.c.bf16 %v108_v0, %v105_v63 }
  0x48   :  { %427 = vmatprep.subr.bf16.mxu0 %v426_v26  ;;  %481 = vmatpush3.bf16.msra.mxu1 %v480_v50  ;;  %v137_v8 = vld [vmem:[#allocation7 + $0x250] sm:$0xff]  ;;  %v140_v9 = vld [vmem:[#allocation7 + $0x268] sm:$0xff]  ;;  %v111_v11 = vld [vmem:[#allocation7 + $0x180] sm:$0xff]  ;;  %v488_v13 = vpack.c.bf16 %v86_v6, %v83_v5  ;;  %v442_v15 = vpack.c.bf16 %v115_v7, %v112_v3 }
  0x49   :  { %483 = vmatprep.subr.bf16.mxu1 %v482_v57  ;;  %v114_v12 = vld [vmem:[#allocation7 + $0x198] sm:$0xff]  ;;  %v61_v14 = vld [vmem:[#allocation5] sm:$0xff]  ;;  %v490_v17 = vpack.c.bf16 %v140_v9, %v137_v8  ;;  %v92_v19 = vld [vmem:[#allocation7 + $0xe8] sm:$0xff] }
  0x4a   :  { %v118_v16 = vld [vmem:[#allocation7 + $0x1b8] sm:$0xff]  ;;  %v89_v18 = vld [vmem:[#allocation7 + $0xd0] sm:$0xff]  ;;  %240 = vmatprep.mubr.f32.mxu0 %v61_v14  ;;  %v143_v21 = vld [vmem:[#allocation7 + $0x280] sm:$0xff]  ;;  %317 = vmatprep.mubr.f32.mxu1 %v61_v14  ;;  %v444_v23 = vpack.c.bf16 %v114_v12, %v111_v11 }
  0x4b   :  { %429 = vmatpush1.bf16.msra.mxu0 %v428_v33  ;;  %v121_v20 = vld [vmem:[#allocation7 + $0x1d0] sm:$0xff]  ;;  %v146_v22 = vld [vmem:[#allocation7 + $0x298] sm:$0xff]  ;;  %v120_v25 = vld [vmem:[#allocation7 + $0x1c8] sm:$0xff]  ;;  %v492_v26 = vpack.c.bf16 %v92_v19, %v89_v18 }
  0x4c   :  { %431 = vmatprep.subr.bf16.mxu0 %v430_v37  ;;  %485 = vmatpush3.bf16.msra.mxu1 %v484_v1  ;;  %v117_v24 = vld [vmem:[#allocation7 + $0x1b0] sm:$0xff]  ;;  %v446_v27 = vpack.c.bf16 %v121_v20, %v118_v16  ;;  %v124_v28 = vld [vmem:[#allocation7 + $0x1e8] sm:$0xff]  ;;  %v494_v29 = vpack.c.bf16 %v146_v22, %v143_v21  ;;  %v95_v30 = vld [vmem:[#allocation7 + $0x100] sm:$0xff]  ;;  %v161_v21 = vlaneseq }
  0x4d   :  { %487 = vmatprep.subr.bf16.mxu1 %v486_v4  ;;  %v98_v31 = vld [vmem:[#allocation7 + $0x118] sm:$0xff]  ;;  %v127_v32 = vld [vmem:[#allocation7 + $0x200] sm:$0xff]  ;;  %v149_v33 = vld [vmem:[#allocation7 + $0x2b0] sm:$0xff]  ;;  %v448_v35 = vpack.c.bf16 %v120_v25, %v117_v24 }
  0x4e   :  { %v152_v34 = vld [vmem:[#allocation7 + $0x2c8] sm:$0xff]  ;;  %v123_v36 = vld [vmem:[#allocation7 + $0x1e0] sm:$0xff]  ;;  %v126_v37 = vld [vmem:[#allocation7 + $0x1f8] sm:$0xff]  ;;  %v496_v38 = vpack.c.bf16 %v98_v31, %v95_v30  ;;  %v450_v39 = vpack.c.bf16 %v127_v32, %v124_v28  ;;  %v162_v25 = vshrl.u32 %v161_v21, 7 }
  0x4f   :  { %433 = vmatpush1.bf16.msra.mxu0 %v432_v48  ;;  %v130_v40 = vld [vmem:[#allocation7 + $0x218] sm:$0xff]  ;;  %v498_v41 = vpack.c.bf16 %v152_v34, %v149_v33  ;;  %v101_v42 = vld [vmem:[#allocation7 + $0x130] sm:$0xff]  ;;  %v104_v43 = vld [vmem:[#allocation7 + $0x148] sm:$0xff]  ;;  %v452_v47 = vpack.c.bf16 %v126_v37, %v123_v36 }
  0x50   :  { %435 = vmatprep.subr.bf16.mxu0 %v434_v52  ;;  %489 = vmatpush3.bf16.msra.mxu1 %v488_v13  ;;  %v133_v44 = vld [vmem:[#allocation7 + $0x230] sm:$0xff]  ;;  %v155_v45 = vld [vmem:[#allocation7 + $0x2e0] sm:$0xff]  ;;  %v158_v46 = vld [vmem:[#allocation7 + $0x2f8] sm:$0xff]  ;;  %v500_v49 = vpack.c.bf16 %v104_v43, %v101_v42  ;;  %v163_v28 = vsub.s32 0, %v162_v25  ;;  %v167_v30 = vsub.s32 1, %v162_v25  ;;  %v171_v42 = vsub.s32 2, %v162_v25 }
  0x51   :  { %491 = vmatprep.subr.bf16.mxu1 %v490_v17  ;;  %v129_v48 = vld [vmem:[#allocation7 + $0x210] sm:$0xff]  ;;  %v454_v50 = vpack.c.bf16 %v133_v44, %v130_v40  ;;  %v132_v51 = vld [vmem:[#allocation7 + $0x228] sm:$0xff]  ;;  %v502_v52 = vpack.c.bf16 %v158_v46, %v155_v45  ;;  %v107_v53 = vld [vmem:[#allocation7 + $0x160] sm:$0xff] }
  0x52   :  { %v110_v54 = vld [vmem:[#allocation7 + $0x178] sm:$0xff]  ;;  %v136_v55 = vld [vmem:[#allocation7 + $0x248] sm:$0xff]  ;;  %v139_v56 = vld [vmem:[#allocation7 + $0x260] sm:$0xff]  ;;  %v456_v57 = vpack.c.bf16 %v132_v51, %v129_v48 }
  0x53   :  { %437 = vmatpush1.bf16.msra.mxu0 %v436_v62  ;;  %v504_v58 = vpack.c.bf16 %v110_v54, %v107_v53  ;;  %v458_v59 = vpack.c.bf16 %v139_v56, %v136_v55  ;;  %v135_v60 = vld [vmem:[#allocation7 + $0x240] sm:$0xff]  ;;  %v138_v61 = vld [vmem:[#allocation7 + $0x258] sm:$0xff]  ;;  %v145_v63 = vld [vmem:[#allocation7 + $0x290] sm:$0xff] }
  0x54   :  { %439 = vmatprep.subr.bf16.mxu0 %v438_v2  ;;  %493 = vmatpush3.bf16.msra.mxu1 %v492_v26  ;;  %v142_v62 = vld [vmem:[#allocation7 + $0x278] sm:$0xff]  ;;  %v460_v0 = vpack.c.bf16 %v138_v61, %v135_v60  ;;  %v141_v2 = vld [vmem:[#allocation7 + $0x270] sm:$0xff]  ;;  %v144_v3 = vld [vmem:[#allocation7 + $0x288] sm:$0xff] }
  0x55   :  { %495 = vmatprep.subr.bf16.mxu1 %v494_v29  ;;  %v462_v1 = vpack.c.bf16 %v145_v63, %v142_v62  ;;  %v148_v4 = vld [vmem:[#allocation7 + $0x2a8] sm:$0xff]  ;;  %v151_v5 = vld [vmem:[#allocation7 + $0x2c0] sm:$0xff]  ;;  %v62_v7 = vld [vmem:[#allocation5 + $0x8] sm:$0xff]  ;;  %v464_v8 = vpack.c.bf16 %v144_v3, %v141_v2 }
  0x56   :  { %v698_v6 = vld [vmem:[#allocation2] sm:$0xff]  ;;  %v466_v9 = vpack.c.bf16 %v151_v5, %v148_v4  ;;  %v150_v11 = vld [vmem:[#allocation7 + $0x2b8] sm:$0xff]  ;;  %v157_v13 = vld [vmem:[#allocation7 + $0x2f0] sm:$0xff] }
  0x57   :  { %441 = vmatpush1.bf16.msra.mxu0 %v440_v10  ;;  %v147_v10 = vld [vmem:[#allocation7 + $0x2a0] sm:$0xff]  ;;  %v154_v12 = vld [vmem:[#allocation7 + $0x2d8] sm:$0xff]  ;;  %v701_v14 = vld [vmem:[#allocation2 + $0x8] sm:$0xff] }
  0x58   :  { %443 = vmatprep.subr.bf16.mxu0 %v442_v15  ;;  %497 = vmatpush3.bf16.msra.mxu1 %v496_v38  ;;  %v468_v15 = vpack.c.bf16 %v150_v11, %v147_v10  ;;  %v470_v16 = vpack.c.bf16 %v157_v13, %v154_v12  ;;  %v153_v17 = vld [vmem:[#allocation7 + $0x2d0] sm:$0xff]  ;;  %v156_v18 = vld [vmem:[#allocation7 + $0x2e8] sm:$0xff]  ;;  %v159_v29 = vld [vmem:[%s729_s3] sm:$0x7]  ;;  %s623_s3 = smov [#allocation8]  }
  0x59   :  { %499 = vmatprep.subr.bf16.mxu1 %v498_v41  ;;  %v472_v19 = vpack.c.bf16 %v156_v18, %v153_v17  ;;  %v164_v31 = vrot.slane %v159_v29, %v163_v28  ;;  %v168_v32 = vrot.slane %v159_v29, %v167_v30  ;;  %v172_v46 = vrot.slane %v159_v29, %v171_v42  ;;  %s359_s30 = sshll.u32 %s623_s3, 4  ;;  %s360_s30 = int_to_ptr.vmem [resolvable:$true] %s359_s30 }
  0x5a   :  { %s588_s5 = scalar_lea.vmem %s360_s30, 256  ;;  %p593_p11 = scmp.lt.s32.totalorder %s360_s30, %s360_s30 }
  0x5b   :  { %445 = vmatpush1.bf16.msra.mxu0 %v444_v23  ;;  %p589_p10 = scmp.ne.s32.totalorder %s360_s30, %s588_s5  ;;  %p594_p12 = scmp.lt.s32.totalorder %s588_s5, %s588_s5 }
  0x5c   :  { %447 = vmatprep.subr.bf16.mxu0 %v446_v27  ;;  %501 = vmatpush3.bf16.msra.mxu1 %v500_v49 }
  0x5d   :  { %503 = vmatprep.subr.bf16.mxu1 %v502_v52  ;;  %p595_p13 = por %p594_p12, %p593_p11 }
  0x5f   :  { %449 = vmatpush1.bf16.msra.mxu0 %v448_v35  ;;  %p596_p0 = pnand %p595_p13, %p589_p10 }
  0x60   :  { %451 = vmatprep.subr.bf16.mxu0 %v450_v39  ;;  %505 = vmatpush3.bf16.msra.mxu1 %v504_v58 }
  0x63   :  { %453 = vmatpush1.bf16.msra.mxu0 %v452_v47  ;;  %318 = vmatmul.mubr.f32.vlgmr.msra.gmra.mrb[0].mxu1 %v698_v6 }
  0x64   :  { %455 = vmatprep.subr.bf16.mxu0 %v454_v50  ;;  %322 = vmatprep.mubr.f32.mxu1 %v62_v7 }
  0x67   :  { %457 = vmatpush1.bf16.msra.mxu0 %v456_v57  ;;  %323 = vmatmul.mubr.f32.gmra.mrb[2].mxu1 %v701_v14 }
  0x68   :  { %459 = vmatprep.subr.bf16.mxu0 %v458_v59 }
  0x6b   :  { %461 = vmatpush1.bf16.msra.mxu0 %v460_v0 }
  0x6c   :  { %463 = vmatprep.subr.bf16.mxu0 %v462_v1 }
  0x6f   :  { %465 = vmatpush1.bf16.msra.mxu0 %v464_v8 }
  0x70   :  { %467 = vmatprep.subr.bf16.mxu0 %v466_v9 }
  0x73   :  { %469 = vmatpush1.bf16.msra.mxu0 %v468_v15 }
  0x74   :  { %471 = vmatprep.subr.bf16.mxu0 %v470_v16 }
  0x77   :  { %473 = vmatpush1.bf16.msra.mxu0 %v472_v19 }
  0x7a   :  { %241 = vmatmul.mubr.f32.vlgmr.msra.gmra.mrb[0].mxu0 %v698_v6 }
  0x7b   :  { %246 = vmatprep.mubr.f32.mxu0 %v62_v7 }
  0x7e   :  { %247 = vmatmul.mubr.f32.gmra.mrb[2].mxu0 %v701_v14 }
 0x136   :  { %v404_v20 = vpop.f32.mrb[0].mxu1 }
 0x137   :  { %v405_v22 = vpop.f32.mrb[1].mxu1 }
 0x138   :  { %v406_v23 = vadd.f32 %v405_v22, %v404_v20 }
 0x13a   :  { %v407_v24 = vpop.f32.mrb[2].mxu1  ;;  %v320_v47 = vadd.f32 %v406_v23, %v172_v46 }
 0x13b   :  { %v408_v26 = vpop.f32.mrb[3].mxu1 }
 0x13c   :  { %v409_v27 = vadd.f32 %v408_v26, %v407_v24  ;;  %v344_v52 = vmax.f32 %v320_v47, 0.0 }
 0x13e   :  { %v325_v53 = vadd.f32 %v409_v27, %v172_v46 }
 0x140   :  { %v345_v62 = vmax.f32 %v325_v53, 0.0 }
 0x14d   :  { %v242_v33 = vpop.f32.mrb[0].mxu0 }
 0x14e   :  { %v243_v34 = vadd.f32 %v242_v33, %v164_v31  ;;  %v244_v35 = vpop.f32.mrb[1].mxu0 }
 0x14f   :  { %v245_v36 = vadd.f32 %v244_v35, %v168_v32 }
 0x150   :  { %v328_v37 = vmul.f32 0.5, %v243_v34 }
 0x151   :  { %v329_v38 = vmul.f32 0.5, %v245_v36  ;;  %v248_v39 = vpop.f32.mrb[2].mxu0 }
 0x152   :  { %514 = vtanh.f32 %v328_v37  ;;  %v249_v40 = vadd.f32 %v248_v39, %v164_v31  ;;  %v250_v41 = vpop.f32.mrb[3].mxu0 }
 0x153   :  { %516 = vtanh.f32 %v329_v38  ;;  %v251_v43 = vadd.f32 %v250_v41, %v168_v32 }
 0x154   :  { %v330_v44 = vmul.f32 0.5, %v249_v40 }
 0x155   :  { %v331_v45 = vmul.f32 0.5, %v251_v43 }
 0x156   :  { %518 = vtanh.f32 %v330_v44 }
 0x157   :  { %520 = vtanh.f32 %v331_v45 }
 0x15c   :  { %v515_v48 = vpop.eup %514 }
 0x15d   :  { %v517_v49 = vpop.eup %516  ;;  %v336_v50 = vmul.f32 0.5, %v515_v48 }
 0x15e   :  { %v337_v51 = vmul.f32 0.5, %v517_v49 }
 0x15f   :  { %v340_v54 = vadd.f32 0.5, %v336_v50 }
 0x160   :  { %v519_v55 = vpop.eup %518  ;;  %v341_v56 = vadd.f32 0.5, %v337_v51 }
 0x161   :  { %v521_v57 = vpop.eup %520  ;;  %v346_v58 = vmul.f32 %v340_v54, %v698_v6  ;;  %v338_v59 = vmul.f32 0.5, %v519_v55 }
 0x162   :  { %v339_v60 = vmul.f32 0.5, %v521_v57  ;;  %v348_v61 = vmul.f32 %v344_v52, %v341_v56 }
 0x163   :  { %v342_v63 = vadd.f32 0.5, %v338_v59 }
 0x164   :  { %v343_v0 = vadd.f32 0.5, %v339_v60  ;;  %v350_v1 = vadd.f32 %v348_v61, %v346_v58 }
 0x165   :  { %v347_v2 = vmul.f32 %v342_v63, %v701_v14 }
 0x166   :  { %v349_v3 = vmul.f32 %v345_v62, %v343_v0  ;;  %352 = vst [vmem:[#allocation8] sm:$0xff] %v350_v1 }
 0x168   :  { %v351_v4 = vadd.f32 %v349_v3, %v347_v2 }
 0x16a   :  { %353 = vst [vmem:[#allocation8 + $0x8] sm:$0xff] %v351_v4 }
 0x16b   :  { %599 = shalt.err (!%p596_p0)
}
 0x16c   :  { %s600_s8 = scalar_lea.hbm %s730_s4, 256 }
 0x16d   :  { %p601_p1 = scmp.ne.s32.totalorder %s730_s4, %s600_s8  ;;  %p604_p2 = scmp.lt.u32.totalorder %s600_s8, %s730_s4 }
 0x16f   :  { %p606_p3 = pnand %p604_p2, %p601_p1 }
 0x171   :  { %609 = shalt.err (!%p606_p3)
}
 0x172   :  { %365 = dma.vmem_to_hbm [thread:$0]  %s360_s30, 256, %s730_s4, [#allocation4], %s618_s27, %s618_s27, %s619_s28  }
 0x173   :  { %614 = dma.done.wait [#allocation4], 256  }
 0x174   :  { %615 = vsyncadd [#allocation4], 4294967040 }
 0x175   :  { %369 = vsyncpa [#allocation3], 1 }
 0x176   :  { %370 = vsyncpa [#allocation6], 1 }
 0x177   :  { %371 = vsyncpa [#allocation4], 1 }

// kernel: tpu_custom_call.1
= control target key start
LH: loop header
LB: loop body
LE: loop exit
PB: predicated region body
PF: predicated region fallthrough
CT: control target
= control target key end

     0   :  { %9 = vsyncpa [#allocation3], 0  ;;  %s726_s0 = inlined_call_operand.hbm [shape: f32[16,128], index: 0, kind: input, shape index: {}]   ;;  %s727_s1 = inlined_call_operand.hbm [shape: f32[16,128], index: 1, kind: input, shape index: {}]   ;;  %s728_s2 = inlined_call_operand.hbm [shape: f32[256,384], index: 2, kind: input, shape index: {}]   ;;  %s729_s3 = inlined_call_operand.vmem [shape: f32[1,384], index: 3, kind: input, shape index: {}]   ;;  %s730_s4 = inlined_call_operand.hbm [shape: f32[16,128], index: 4, kind: output, shape index: {}]  }
   0x1   :  { %10 = vsyncpa [#allocation6], 0 }
   0x2   :  { %11 = vsyncpa [#allocation4], 0  ;;  %s616_s15 = smov [#allocation5]   ;;  %s617_s17 = smov [#allocation2]  }
   0x3   :  { %s29_s16 = sshll.u32 %s616_s15, 4  ;;  %s17_s18 = sshll.u32 %s617_s17, 4  ;;  %s30_s16 = int_to_ptr.vmem [resolvable:$true] %s29_s16  ;;  %s649_s18 = int_to_ptr.vmem [resolvable:$true] %s17_s18 }
   0x4   :  { %s522_s21 = scalar_lea.hbm %s727_s1, 256 }
   0x5   :  { %p523_p0 = scmp.ne.s32.totalorder %s727_s1, %s522_s21  ;;  %p526_p1 = scmp.lt.u32.totalorder %s522_s21, %s727_s1 }
   0x7   :  { %p528_p2 = pnand %p526_p1, %p523_p0 }
   0x9   :  { %531 = shalt.err (!%p528_p2)
}
   0xa   :  { %s532_s26 = scalar_lea.vmem %s30_s16, 256  ;;  %p537_p4 = scmp.lt.s32.totalorder %s30_s16, %s30_s16 }
   0xb   :  { %p533_p3 = scmp.ne.s32.totalorder %s30_s16, %s532_s26  ;;  %p538_p5 = scmp.lt.s32.totalorder %s532_s26, %s532_s26 }
   0xd   :  { %p539_p6 = por %p538_p5, %p537_p4 }
   0xf   :  { %p540_p7 = pnand %p539_p6, %p533_p3 }
  0x11   :  { %543 = shalt.err (!%p540_p7)
}
  0x12   :  { %s618_s27 = smov 128   ;;  %s619_s28 = smov 8  }
  0x13   :  { %35 = dma.hbm_to_vmem [thread:$0]  %s727_s1, 256, %s30_s16, [#allocation6], %s618_s27, %s618_s27, %s619_s28  }
  0x14   :  { %s544_s7 = scalar_lea.hbm %s726_s0, 256 }
  0x15   :  { %p545_p8 = scmp.ne.s32.totalorder %s726_s0, %s544_s7  ;;  %p548_p9 = scmp.lt.u32.totalorder %s544_s7, %s726_s0 }
  0x17   :  { %p550_p10 = pnand %p548_p9, %p545_p8 }
  0x19   :  { %553 = shalt.err (!%p550_p10)
}
  0x1a   :  { %s554_s12 = scalar_lea.vmem %s649_s18, 256  ;;  %p559_p12 = scmp.lt.s32.totalorder %s649_s18, %s649_s18 }
  0x1b   :  { %p555_p11 = scmp.ne.s32.totalorder %s649_s18, %s554_s12  ;;  %p560_p13 = scmp.lt.s32.totalorder %s554_s12, %s554_s12 }
  0x1d   :  { %p561_p0 = por %p560_p13, %p559_p12 }
  0x1f   :  { %p562_p1 = pnand %p561_p0, %p555_p11 }
  0x21   :  { %565 = shalt.err (!%p562_p1)
}
  0x22   :  { %23 = dma.hbm_to_vmem [thread:$0]  %s726_s0, 256, %s649_s18, [#allocation3], %s618_s27, %s618_s27, %s619_s28  }
  0x23   :  { %s620_s14 = smov [#allocation7]   ;;  %s566_s19 = scalar_lea.hbm %s728_s2, 12288 }
  0x24   :  { %s41_s15 = sshll.u32 %s620_s14, 4  ;;  %p567_p2 = scmp.ne.s32.totalorder %s728_s2, %s566_s19  ;;  %s42_s15 = int_to_ptr.vmem [resolvable:$true] %s41_s15 }
  0x25   :  { %p570_p3 = scmp.lt.u32.totalorder %s566_s19, %s728_s2 }
  0x27   :  { %p572_p4 = pnand %p570_p3, %p567_p2 }
  0x29   :  { %575 = shalt.err (!%p572_p4)
}
  0x2a   :  { %s576_s24 = scalar_lea.vmem %s42_s15, 12288  ;;  %p581_p6 = scmp.lt.s32.totalorder %s42_s15, %s42_s15 }
  0x2b   :  { %p577_p5 = scmp.ne.s32.totalorder %s42_s15, %s576_s24  ;;  %p582_p7 = scmp.lt.s32.totalorder %s576_s24, %s576_s24 }
  0x2d   :  { %p583_p8 = por %p582_p7, %p581_p6 }
  0x2f   :  { %p584_p9 = pnand %p583_p8, %p577_p5 }
  0x31   :  { %587 = shalt.err (!%p584_p9)
}
  0x32   :  { %s621_s0 = smov 384   ;;  %s622_s18 = smov 24  }
  0x33   :  { %47 = dma.hbm_to_vmem [thread:$0]  %s728_s2, 12288, %s42_s15, [#allocation6], %s621_s0, %s621_s0, %s622_s18  }
  0x34   :  { %610 = dma.done.wait [#allocation3], 256  }
  0x35   :  { %611 = vsyncadd [#allocation3], 4294967040 }
  0x36   :  { %612 = dma.done.wait [#allocation6], 12544  }
  0x37   :  { %613 = vsyncadd [#allocation6], 4294954752  ;;  %v64_v0 = vld [vmem:[#allocation7 + $0x8] sm:$0xff]  ;;  %v67_v1 = vld [vmem:[#allocation7 + $0x20] sm:$0xff] }
  0x38   :  { %v63_v2 = vld [vmem:[#allocation7] sm:$0xff]  ;;  %v410_v3 = vpack.c.bf16 %v67_v1, %v64_v0  ;;  %v66_v4 = vld [vmem:[#allocation7 + $0x18] sm:$0xff]  ;;  %v73_v6 = vld [vmem:[#allocation7 + $0x50] sm:$0xff] }
  0x39   :  { %v70_v5 = vld [vmem:[#allocation7 + $0x38] sm:$0xff]  ;;  %v412_v7 = vpack.c.bf16 %v66_v4, %v63_v2  ;;  %v69_v9 = vld [vmem:[#allocation7 + $0x30] sm:$0xff]  ;;  %v72_v10 = vld [vmem:[#allocation7 + $0x48] sm:$0xff] }
  0x3a   :  { %v414_v8 = vpack.c.bf16 %v73_v6, %v70_v5  ;;  %v76_v11 = vld [vmem:[#allocation7 + $0x68] sm:$0xff]  ;;  %411 = vmatprep.subr.bf16.mxu0 %v410_v3  ;;  %v79_v12 = vld [vmem:[#allocation7 + $0x80] sm:$0xff]  ;;  %v416_v13 = vpack.c.bf16 %v72_v10, %v69_v9  ;;  %v78_v16 = vld [vmem:[#allocation7 + $0x78] sm:$0xff] }
  0x3b   :  { %413 = vmatpush1.bf16.msra.mxu0 %v412_v7  ;;  %v418_v14 = vpack.c.bf16 %v79_v12, %v76_v11  ;;  %v75_v15 = vld [vmem:[#allocation7 + $0x60] sm:$0xff]  ;;  %v82_v17 = vld [vmem:[#allocation7 + $0x98] sm:$0xff]  ;;  %v85_v18 = vld [vmem:[#allocation7 + $0xb0] sm:$0xff] }
  0x3c   :  { %415 = vmatprep.subr.bf16.mxu0 %v414_v8  ;;  %v420_v19 = vpack.c.bf16 %v78_v16, %v75_v15  ;;  %v422_v20 = vpack.c.bf16 %v85_v18, %v82_v17  ;;  %v81_v21 = vld [vmem:[#allocation7 + $0x90] sm:$0xff]  ;;  %v84_v22 = vld [vmem:[#allocation7 + $0xa8] sm:$0xff]  ;;  %v91_v24 = vld [vmem:[#allocation7 + $0xe0] sm:$0xff] }
  0x3d   :  { %v88_v23 = vld [vmem:[#allocation7 + $0xc8] sm:$0xff]  ;;  %v424_v25 = vpack.c.bf16 %v84_v22, %v81_v21  ;;  %v87_v27 = vld [vmem:[#allocation7 + $0xc0] sm:$0xff]  ;;  %v90_v28 = vld [vmem:[#allocation7 + $0xd8] sm:$0xff] }
  0x3e   :  { %v426_v26 = vpack.c.bf16 %v91_v24, %v88_v23  ;;  %v94_v29 = vld [vmem:[#allocation7 + $0xf8] sm:$0xff]  ;;  %v97_v30 = vld [vmem:[#allocation7 + $0x110] sm:$0xff]  ;;  %v116_v32 = vld [vmem:[#allocation7 + $0x1a8] sm:$0xff]  ;;  %v428_v33 = vpack.c.bf16 %v90_v28, %v87_v27 }
  0x3f   :  { %417 = vmatpush1.bf16.msra.mxu0 %v416_v13  ;;  %v113_v31 = vld [vmem:[#allocation7 + $0x190] sm:$0xff]  ;;  %v430_v37 = vpack.c.bf16 %v97_v30, %v94_v29  ;;  %v96_v38 = vld [vmem:[#allocation7 + $0x108] sm:$0xff]  ;;  %v103_v41 = vld [vmem:[#allocation7 + $0x140] sm:$0xff] }
  0x40   :  { %419 = vmatprep.subr.bf16.mxu0 %v418_v14  ;;  %v93_v34 = vld [vmem:[#allocation7 + $0xf0] sm:$0xff]  ;;  %v474_v35 = vpack.c.bf16 %v116_v32, %v113_v31  ;;  %v100_v39 = vld [vmem:[#allocation7 + $0x128] sm:$0xff]  ;;  %v119_v43 = vld [vmem:[#allocation7 + $0x1c0] sm:$0xff] }
  0x41   :  { %v65_v36 = vld [vmem:[#allocation7 + $0x10] sm:$0xff]  ;;  %v68_v40 = vld [vmem:[#allocation7 + $0x28] sm:$0xff]  ;;  %v122_v44 = vld [vmem:[#allocation7 + $0x1d8] sm:$0xff]  ;;  %v432_v48 = vpack.c.bf16 %v96_v38, %v93_v34  ;;  %v434_v52 = vpack.c.bf16 %v103_v41, %v100_v39 }
  0x42   :  { %475 = vmatprep.subr.bf16.mxu1 %v474_v35  ;;  %v476_v42 = vpack.c.bf16 %v68_v40, %v65_v36  ;;  %v478_v45 = vpack.c.bf16 %v122_v44, %v119_v43  ;;  %v71_v46 = vld [vmem:[#allocation7 + $0x40] sm:$0xff]  ;;  %v74_v47 = vld [vmem:[#allocation7 + $0x58] sm:$0xff]  ;;  %v125_v51 = vld [vmem:[#allocation7 + $0x1f0] sm:$0xff] }
  0x43   :  { %421 = vmatpush1.bf16.msra.mxu0 %v420_v19  ;;  %v99_v49 = vld [vmem:[#allocation7 + $0x120] sm:$0xff]  ;;  %v480_v50 = vpack.c.bf16 %v74_v47, %v71_v46  ;;  %v102_v53 = vld [vmem:[#allocation7 + $0x138] sm:$0xff]  ;;  %v128_v55 = vld [vmem:[#allocation7 + $0x208] sm:$0xff] }
  0x44   :  { %423 = vmatprep.subr.bf16.mxu0 %v422_v20  ;;  %477 = vmatpush3.bf16.msra.mxu1 %v476_v42  ;;  %v106_v54 = vld [vmem:[#allocation7 + $0x158] sm:$0xff]  ;;  %v109_v56 = vld [vmem:[#allocation7 + $0x170] sm:$0xff]  ;;  %v482_v57 = vpack.c.bf16 %v128_v55, %v125_v51  ;;  %v80_v59 = vld [vmem:[#allocation7 + $0x88] sm:$0xff]  ;;  %v436_v62 = vpack.c.bf16 %v102_v53, %v99_v49 }
  0x45   :  { %479 = vmatprep.subr.bf16.mxu1 %v478_v45  ;;  %v77_v58 = vld [vmem:[#allocation7 + $0x70] sm:$0xff]  ;;  %v131_v60 = vld [vmem:[#allocation7 + $0x220] sm:$0xff]  ;;  %v134_v61 = vld [vmem:[#allocation7 + $0x238] sm:$0xff]  ;;  %v438_v2 = vpack.c.bf16 %v109_v56, %v106_v54 }
  0x46   :  { %v105_v63 = vld [vmem:[#allocation7 + $0x150] sm:$0xff]  ;;  %v108_v0 = vld [vmem:[#allocation7 + $0x168] sm:$0xff]  ;;  %v484_v1 = vpack.c.bf16 %v80_v59, %v77_v58  ;;  %v486_v4 = vpack.c.bf16 %v134_v61, %v131_v60  ;;  %v83_v5 = vld [vmem:[#allocation7 + $0xa0] sm:$0xff] }
  0x47   :  { %425 = vmatpush1.bf16.msra.mxu0 %v424_v25  ;;  %v112_v3 = vld [vmem:[#allocation7 + $0x188] sm:$0xff]  ;;  %v86_v6 = vld [vmem:[#allocation7 + $0xb8] sm:$0xff]  ;;  %v115_v7 = vld [vmem:[#allocation7 + $0x1a0] sm:$0xff]  ;;  %v440_v10 = vpack.c.bf16 %v108_v0, %v105_v63 }
  0x48   :  { %427 = vmatprep.subr.bf16.mxu0 %v426_v26  ;;  %481 = vmatpush3.bf16.msra.mxu1 %v480_v50  ;;  %v137_v8 = vld [vmem:[#allocation7 + $0x250] sm:$0xff]  ;;  %v140_v9 = vld [vmem:[#allocation7 + $0x268] sm:$0xff]  ;;  %v111_v11 = vld [vmem:[#allocation7 + $0x180] sm:$0xff]  ;;  %v488_v13 = vpack.c.bf16 %v86_v6, %v83_v5  ;;  %v442_v15 = vpack.c.bf16 %v115_v7, %v112_v3 }
  0x49   :  { %483 = vmatprep.subr.bf16.mxu1 %v482_v57  ;;  %v114_v12 = vld [vmem:[#allocation7 + $0x198] sm:$0xff]  ;;  %v61_v14 = vld [vmem:[#allocation5] sm:$0xff]  ;;  %v490_v17 = vpack.c.bf16 %v140_v9, %v137_v8  ;;  %v92_v19 = vld [vmem:[#allocation7 + $0xe8] sm:$0xff] }
  0x4a   :  { %v118_v16 = vld [vmem:[#allocation7 + $0x1b8] sm:$0xff]  ;;  %v89_v18 = vld [vmem:[#allocation7 + $0xd0] sm:$0xff]  ;;  %240 = vmatprep.mubr.f32.mxu0 %v61_v14  ;;  %v143_v21 = vld [vmem:[#allocation7 + $0x280] sm:$0xff]  ;;  %317 = vmatprep.mubr.f32.mxu1 %v61_v14  ;;  %v444_v23 = vpack.c.bf16 %v114_v12, %v111_v11 }
  0x4b   :  { %429 = vmatpush1.bf16.msra.mxu0 %v428_v33  ;;  %v121_v20 = vld [vmem:[#allocation7 + $0x1d0] sm:$0xff]  ;;  %v146_v22 = vld [vmem:[#allocation7 + $0x298] sm:$0xff]  ;;  %v120_v25 = vld [vmem:[#allocation7 + $0x1c8] sm:$0xff]  ;;  %v492_v26 = vpack.c.bf16 %v92_v19, %v89_v18 }
  0x4c   :  { %431 = vmatprep.subr.bf16.mxu0 %v430_v37  ;;  %485 = vmatpush3.bf16.msra.mxu1 %v484_v1  ;;  %v117_v24 = vld [vmem:[#allocation7 + $0x1b0] sm:$0xff]  ;;  %v446_v27 = vpack.c.bf16 %v121_v20, %v118_v16  ;;  %v124_v28 = vld [vmem:[#allocation7 + $0x1e8] sm:$0xff]  ;;  %v494_v29 = vpack.c.bf16 %v146_v22, %v143_v21  ;;  %v95_v30 = vld [vmem:[#allocation7 + $0x100] sm:$0xff]  ;;  %v161_v21 = vlaneseq }
  0x4d   :  { %487 = vmatprep.subr.bf16.mxu1 %v486_v4  ;;  %v98_v31 = vld [vmem:[#allocation7 + $0x118] sm:$0xff]  ;;  %v127_v32 = vld [vmem:[#allocation7 + $0x200] sm:$0xff]  ;;  %v149_v33 = vld [vmem:[#allocation7 + $0x2b0] sm:$0xff]  ;;  %v448_v35 = vpack.c.bf16 %v120_v25, %v117_v24 }
  0x4e   :  { %v152_v34 = vld [vmem:[#allocation7 + $0x2c8] sm:$0xff]  ;;  %v123_v36 = vld [vmem:[#allocation7 + $0x1e0] sm:$0xff]  ;;  %v126_v37 = vld [vmem:[#allocation7 + $0x1f8] sm:$0xff]  ;;  %v496_v38 = vpack.c.bf16 %v98_v31, %v95_v30  ;;  %v450_v39 = vpack.c.bf16 %v127_v32, %v124_v28  ;;  %v162_v25 = vshrl.u32 %v161_v21, 7 }
  0x4f   :  { %433 = vmatpush1.bf16.msra.mxu0 %v432_v48  ;;  %v130_v40 = vld [vmem:[#allocation7 + $0x218] sm:$0xff]  ;;  %v498_v41 = vpack.c.bf16 %v152_v34, %v149_v33  ;;  %v101_v42 = vld [vmem:[#allocation7 + $0x130] sm:$0xff]  ;;  %v104_v43 = vld [vmem:[#allocation7 + $0x148] sm:$0xff]  ;;  %v452_v47 = vpack.c.bf16 %v126_v37, %v123_v36 }
  0x50   :  { %435 = vmatprep.subr.bf16.mxu0 %v434_v52  ;;  %489 = vmatpush3.bf16.msra.mxu1 %v488_v13  ;;  %v133_v44 = vld [vmem:[#allocation7 + $0x230] sm:$0xff]  ;;  %v155_v45 = vld [vmem:[#allocation7 + $0x2e0] sm:$0xff]  ;;  %v158_v46 = vld [vmem:[#allocation7 + $0x2f8] sm:$0xff]  ;;  %v500_v49 = vpack.c.bf16 %v104_v43, %v101_v42  ;;  %v163_v28 = vsub.s32 0, %v162_v25  ;;  %v167_v30 = vsub.s32 1, %v162_v25  ;;  %v171_v42 = vsub.s32 2, %v162_v25 }
  0x51   :  { %491 = vmatprep.subr.bf16.mxu1 %v490_v17  ;;  %v129_v48 = vld [vmem:[#allocation7 + $0x210] sm:$0xff]  ;;  %v454_v50 = vpack.c.bf16 %v133_v44, %v130_v40  ;;  %v132_v51 = vld [vmem:[#allocation7 + $0x228] sm:$0xff]  ;;  %v502_v52 = vpack.c.bf16 %v158_v46, %v155_v45  ;;  %v107_v53 = vld [vmem:[#allocation7 + $0x160] sm:$0xff] }
  0x52   :  { %v110_v54 = vld [vmem:[#allocation7 + $0x178] sm:$0xff]  ;;  %v136_v55 = vld [vmem:[#allocation7 + $0x248] sm:$0xff]  ;;  %v139_v56 = vld [vmem:[#allocation7 + $0x260] sm:$0xff]  ;;  %v456_v57 = vpack.c.bf16 %v132_v51, %v129_v48 }
  0x53   :  { %437 = vmatpush1.bf16.msra.mxu0 %v436_v62  ;;  %v504_v58 = vpack.c.bf16 %v110_v54, %v107_v53  ;;  %v458_v59 = vpack.c.bf16 %v139_v56, %v136_v55  ;;  %v135_v60 = vld [vmem:[#allocation7 + $0x240] sm:$0xff]  ;;  %v138_v61 = vld [vmem:[#allocation7 + $0x258] sm:$0xff]  ;;  %v145_v63 = vld [vmem:[#allocation7 + $0x290] sm:$0xff] }
  0x54   :  { %439 = vmatprep.subr.bf16.mxu0 %v438_v2  ;;  %493 = vmatpush3.bf16.msra.mxu1 %v492_v26  ;;  %v142_v62 = vld [vmem:[#allocation7 + $0x278] sm:$0xff]  ;;  %v460_v0 = vpack.c.bf16 %v138_v61, %v135_v60  ;;  %v141_v2 = vld [vmem:[#allocation7 + $0x270] sm:$0xff]  ;;  %v144_v3 = vld [vmem:[#allocation7 + $0x288] sm:$0xff] }
  0x55   :  { %495 = vmatprep.subr.bf16.mxu1 %v494_v29  ;;  %v462_v1 = vpack.c.bf16 %v145_v63, %v142_v62  ;;  %v148_v4 = vld [vmem:[#allocation7 + $0x2a8] sm:$0xff]  ;;  %v151_v5 = vld [vmem:[#allocation7 + $0x2c0] sm:$0xff]  ;;  %v62_v7 = vld [vmem:[#allocation5 + $0x8] sm:$0xff]  ;;  %v464_v8 = vpack.c.bf16 %v144_v3, %v141_v2 }
  0x56   :  { %v698_v6 = vld [vmem:[#allocation2] sm:$0xff]  ;;  %v466_v9 = vpack.c.bf16 %v151_v5, %v148_v4  ;;  %v150_v11 = vld [vmem:[#allocation7 + $0x2b8] sm:$0xff]  ;;  %v157_v13 = vld [vmem:[#allocation7 + $0x2f0] sm:$0xff] }
  0x57   :  { %441 = vmatpush1.bf16.msra.mxu0 %v440_v10  ;;  %v147_v10 = vld [vmem:[#allocation7 + $0x2a0] sm:$0xff]  ;;  %v154_v12 = vld [vmem:[#allocation7 + $0x2d8] sm:$0xff]  ;;  %v701_v14 = vld [vmem:[#allocation2 + $0x8] sm:$0xff] }
  0x58   :  { %443 = vmatprep.subr.bf16.mxu0 %v442_v15  ;;  %497 = vmatpush3.bf16.msra.mxu1 %v496_v38  ;;  %v468_v15 = vpack.c.bf16 %v150_v11, %v147_v10  ;;  %v470_v16 = vpack.c.bf16 %v157_v13, %v154_v12  ;;  %v153_v17 = vld [vmem:[#allocation7 + $0x2d0] sm:$0xff]  ;;  %v156_v18 = vld [vmem:[#allocation7 + $0x2e8] sm:$0xff]  ;;  %v159_v29 = vld [vmem:[%s729_s3] sm:$0x7]  ;;  %s623_s3 = smov [#allocation8]  }
  0x59   :  { %499 = vmatprep.subr.bf16.mxu1 %v498_v41  ;;  %v472_v19 = vpack.c.bf16 %v156_v18, %v153_v17  ;;  %v164_v31 = vrot.slane %v159_v29, %v163_v28  ;;  %v168_v32 = vrot.slane %v159_v29, %v167_v30  ;;  %v172_v46 = vrot.slane %v159_v29, %v171_v42  ;;  %s359_s30 = sshll.u32 %s623_s3, 4  ;;  %s360_s30 = int_to_ptr.vmem [resolvable:$true] %s359_s30 }
  0x5a   :  { %s588_s5 = scalar_lea.vmem %s360_s30, 256  ;;  %p593_p11 = scmp.lt.s32.totalorder %s360_s30, %s360_s30 }
  0x5b   :  { %445 = vmatpush1.bf16.msra.mxu0 %v444_v23  ;;  %p589_p10 = scmp.ne.s32.totalorder %s360_s30, %s588_s5  ;;  %p594_p12 = scmp.lt.s32.totalorder %s588_s5, %s588_s5 }
  0x5c   :  { %447 = vmatprep.subr.bf16.mxu0 %v446_v27  ;;  %501 = vmatpush3.bf16.msra.mxu1 %v500_v49 }
  0x5d   :  { %503 = vmatprep.subr.bf16.mxu1 %v502_v52  ;;  %p595_p13 = por %p594_p12, %p593_p11 }
  0x5f   :  { %449 = vmatpush1.bf16.msra.mxu0 %v448_v35  ;;  %p596_p0 = pnand %p595_p13, %p589_p10 }
  0x60   :  { %451 = vmatprep.subr.bf16.mxu0 %v450_v39  ;;  %505 = vmatpush3.bf16.msra.mxu1 %v504_v58 }
  0x63   :  { %453 = vmatpush1.bf16.msra.mxu0 %v452_v47  ;;  %318 = vmatmul.mubr.f32.vlgmr.msra.gmra.mrb[0].mxu1 %v698_v6 }
  0x64   :  { %455 = vmatprep.subr.bf16.mxu0 %v454_v50  ;;  %322 = vmatprep.mubr.f32.mxu1 %v62_v7 }
  0x67   :  { %457 = vmatpush1.bf16.msra.mxu0 %v456_v57  ;;  %323 = vmatmul.mubr.f32.gmra.mrb[2].mxu1 %v701_v14 }
  0x68   :  { %459 = vmatprep.subr.bf16.mxu0 %v458_v59 }
  0x6b   :  { %461 = vmatpush1.bf16.msra.mxu0 %v460_v0 }
  0x6c   :  { %463 = vmatprep.subr.bf16.mxu0 %v462_v1 }
  0x6f   :  { %465 = vmatpush1.bf16.msra.mxu0 %v464_v8 }
  0x70   :  { %467 = vmatprep.subr.bf16.mxu0 %v466_v9 }
  0x73   :  { %469 = vmatpush1.bf16.msra.mxu0 %v468_v15 }
  0x74   :  { %471 = vmatprep.subr.bf16.mxu0 %v470_v16 }
  0x77   :  { %473 = vmatpush1.bf16.msra.mxu0 %v472_v19 }
  0x7a   :  { %241 = vmatmul.mubr.f32.vlgmr.msra.gmra.mrb[0].mxu0 %v698_v6 }
  0x7b   :  { %246 = vmatprep.mubr.f32.mxu0 %v62_v7 }
  0x7e   :  { %247 = vmatmul.mubr.f32.gmra.mrb[2].mxu0 %v701_v14 }
 0x136   :  { %v404_v20 = vpop.f32.mrb[0].mxu1 }
 0x137   :  { %v405_v22 = vpop.f32.mrb[1].mxu1 }
 0x138   :  { %v406_v23 = vadd.f32 %v405_v22, %v404_v20 }
 0x13a   :  { %v407_v24 = vpop.f32.mrb[2].mxu1  ;;  %v320_v47 = vadd.f32 %v406_v23, %v172_v46 }
 0x13b   :  { %v408_v26 = vpop.f32.mrb[3].mxu1 }
 0x13c   :  { %v409_v27 = vadd.f32 %v408_v26, %v407_v24  ;;  %v344_v52 = vmax.f32 %v320_v47, 0.0 }
 0x13e   :  { %v325_v53 = vadd.f32 %v409_v27, %v172_v46 }
 0x140   :  { %v345_v62 = vmax.f32 %v325_v53, 0.0 }
 0x14d   :  { %v242_v33 = vpop.f32.mrb[0].mxu0 }
 0x14e   :  { %v243_v34 = vadd.f32 %v242_v33, %v164_v31  ;;  %v244_v35 = vpop.f32.mrb[1].mxu0 }
 0x14f   :  { %v245_v36 = vadd.f32 %v244_v35, %v168_v32 }
 0x150   :  { %v328_v37 = vmul.f32 0.5, %v243_v34 }
 0x151   :  { %v329_v38 = vmul.f32 0.5, %v245_v36  ;;  %v248_v39 = vpop.f32.mrb[2].mxu0 }
 0x152   :  { %514 = vtanh.f32 %v328_v37  ;;  %v249_v40 = vadd.f32 %v248_v39, %v164_v31  ;;  %v250_v41 = vpop.f32.mrb[3].mxu0 }
 0x153   :  { %516 = vtanh.f32 %v329_v38  ;;  %v251_v43 = vadd.f32 %v250_v41, %v168_v32 }
 0x154   :  { %v330_v44 = vmul.f32 0.5, %v249_v40 }
 0x155   :  { %v331_v45 = vmul.f32 0.5, %v251_v43 }
 0x156   :  { %518 = vtanh.f32 %v330_v44 }
 0x157   :  { %520 = vtanh.f32 %v331_v45 }
 0x15c   :  { %v515_v48 = vpop.eup %514 }
 0x15d   :  { %v517_v49 = vpop.eup %516  ;;  %v336_v50 = vmul.f32 0.5, %v515_v48 }
 0x15e   :  { %v337_v51 = vmul.f32 0.5, %v517_v49 }
 0x15f   :  { %v340_v54 = vadd.f32 0.5, %v336_v50 }
 0x160   :  { %v519_v55 = vpop.eup %518  ;;  %v341_v56 = vadd.f32 0.5, %v337_v51 }
 0x161   :  { %v521_v57 = vpop.eup %520  ;;  %v346_v58 = vmul.f32 %v340_v54, %v698_v6  ;;  %v338_v59 = vmul.f32 0.5, %v519_v55 }
 0x162   :  { %v339_v60 = vmul.f32 0.5, %v521_v57  ;;  %v348_v61 = vmul.f32 %v344_v52, %v341_v56 }
 0x163   :  { %v342_v63 = vadd.f32 0.5, %v338_v59 }
 0x164   :  { %v343_v0 = vadd.f32 0.5, %v339_v60  ;;  %v350_v1 = vadd.f32 %v348_v61, %v346_v58 }
 0x165   :  { %v347_v2 = vmul.f32 %v342_v63, %v701_v14 }
 0x166   :  { %v349_v3 = vmul.f32 %v345_v62, %v343_v0  ;;  %352 = vst [vmem:[#allocation8] sm:$0xff] %v350_v1 }
 0x168   :  { %v351_v4 = vadd.f32 %v349_v3, %v347_v2 }
 0x16a   :  { %353 = vst [vmem:[#allocation8 + $0x8] sm:$0xff] %v351_v4 }
 0x16b   :  { %599 = shalt.err (!%p596_p0)
}
 0x16c   :  { %s600_s8 = scalar_lea.hbm %s730_s4, 256 }
 0x16d   :  { %p601_p1 = scmp.ne.s32.totalorder %s730_s4, %s600_s8  ;;  %p604_p2 = scmp.lt.u32.totalorder %s600_s8, %s730_s4 }
 0x16f   :  { %p606_p3 = pnand %p604_p2, %p601_p1 }
 0x171   :  { %609 = shalt.err (!%p606_p3)
}
 0x172   :  { %365 = dma.vmem_to_hbm [thread:$0]  %s360_s30, 256, %s730_s4, [#allocation4], %s618_s27, %s618_s27, %s619_s28  }
 0x173   :  { %614 = dma.done.wait [#allocation4], 256  }
 0x174   :  { %615 = vsyncadd [#allocation4], 4294967040 }
 0x175   :  { %369 = vsyncpa [#allocation3], 1 }
 0x176   :  { %370 = vsyncpa [#allocation6], 1 }
 0x177   :  { %371 = vsyncpa [#allocation4], 1 }

</bundles_post_ra>
